<compile_context>
chip_gen: v6e
topology: v6e:2x2x1
jax: 0.10.0
libtpu: 0.0.40
codegen_flags: <defaults>
</compile_context>

<pallas_src>
import jax
import jax.numpy as jnp
from jax.experimental import pallas as pl
from jax.experimental.pallas import tpu as pltpu


def _transition_kernel(x_ref, w_ref, b_ref, o_ref):
    # x_ref block : (1, 2R, W, Cin)    -> 2R consecutive input rows of one image
    # o_ref block : (1, R, Wout, Cout) -> R pooled output rows
    x = x_ref[0]                                      # (2R, W, Cin)
    two_r, W, Cin = x.shape
    R = two_r // 2
    Wout = W // 2
    Cout = w_ref.shape[1]

    # Sum each 2x2 window BEFORE the matmul (conv is linear; the 1/4 is folded into w).
    xh = x.reshape(R, 2, W, Cin).sum(axis=1)          # pool over H-pairs -> (R, W, Cin)
    xp = xh.reshape(R, Wout, 2, Cin).sum(axis=2)      # pool over W-pairs -> (R, Wout, Cin)

    # 1x1 conv == per-pixel matmul over channels: one MXU matmul with M = R * Wout.
    z = jnp.dot(xp.reshape(R * Wout, Cin), w_ref[...],
                preferred_element_type=jnp.float32)   # (R*Wout, Cout) in f32
    z = z + b_ref[...]                                # (1, Cout) broadcast bias

    o_ref[0] = z.reshape(R, Wout, Cout).astype(o_ref.dtype)


def _pick_rows_per_block(Hout, W, Cin, Cout, itemsize,
                         budget_bytes=12 * 1024 * 1024):
    """Largest divisor R of Hout whose double-buffered input+output blocks fit the budget."""
    Wout = W // 2
    best = 1
    for r in range(1, Hout + 1):
        if Hout % r:
            continue
        blk = (2 * r * W * Cin + r * Wout * Cout) * itemsize
        if 2 * blk <= budget_bytes:   # x2 for pipeline double-buffering
            best = r
    return best


def transition_layer(x_nchw, gamma, beta, running_mean, running_var,
                     conv_w, conv_b, eps=1e-5, compute_dtype=None):
    """x_nchw: (N, Cin, H, W) -> (N, Cout, H//2, W//2), matching the PyTorch module (eval)."""
    N, Cin, H, W = x_nchw.shape
    Cout = conv_w.shape[0]
    assert H % 2 == 0 and W % 2 == 0, "AvgPool2d(2) path assumes even spatial dims"

    if compute_dtype is None:
        compute_dtype = x_nchw.dtype   # use jnp.bfloat16 here on v6e/v7x for 2x less HBM traffic

    # --- wrapper-side glue (plain JAX, fused by XLA) ------------------------------
    # NCHW -> NHWC with the compute-dtype cast fused into the transpose.
    # TODO(synk): if the surrounding model is NHWC end-to-end, both transposes can be dropped.
    x = jnp.transpose(x_nchw, (0, 2, 3, 1)).astype(compute_dtype)      # (N, H, W, Cin)

    # Fold BN (eval) and the AvgPool 1/4 into the conv weight / bias:
    #   pooled = (sum_{2x2} x) @ (0.25 * scale[:,None] * W) + (shift @ W + b)
    scale = (gamma / jnp.sqrt(running_var + eps)).astype(jnp.float32)
    shift = (beta - running_mean * scale).astype(jnp.float32)
    w_t = conv_w.reshape(Cout, Cin).T.astype(jnp.float32)              # (Cin, Cout)
    w_eff = ((0.25 * scale)[:, None] * w_t).astype(compute_dtype)      # (Cin, Cout)
    b_eff = (shift @ w_t + conv_b.astype(jnp.float32)).reshape(1, Cout)  # f32 (1, Cout)

    Hout, Wout = H // 2, W // 2
    R = _pick_rows_per_block(Hout, W, Cin, Cout,
                             jnp.dtype(compute_dtype).itemsize)

    out_nhwc = pl.pallas_call(
        _transition_kernel,
        out_shape=jax.ShapeDtypeStruct((N, Hout, Wout, Cout), x_nchw.dtype),
        grid_spec=pltpu.PrefetchScalarGridSpec(
            num_scalar_prefetch=0,
            grid=(N, Hout // R),
            in_specs=[
                # 2R input rows per R output rows
                pl.BlockSpec((1, 2 * R, W, Cin), lambda n, i: (n, i, 0, 0)),
                pl.BlockSpec((Cin, Cout), lambda n, i: (0, 0)),
                pl.BlockSpec((1, Cout), lambda n, i: (0, 0)),
            ],
            out_specs=pl.BlockSpec((1, R, Wout, Cout), lambda n, i: (n, i, 0, 0)),
        ),
        compiler_params=pltpu.CompilerParams(
            # No accumulator is carried across either axis -> both parallel
            # (lets v7x megacore shard the row-block axis too).
            dimension_semantics=("parallel", "parallel"),
            vmem_limit_bytes=32 * 1024 * 1024,
        ),
    )(x, w_eff, b_eff)

    return jnp.transpose(out_nhwc, (0, 3, 1, 2))                       # back to NCHW


def _reference(x_nchw, gamma, beta, mean, var, conv_w, conv_b, eps=1e-5):
    """Pure-JAX reference matching PyTorch eval-mode BN -> 1x1 conv -> AvgPool2d(2)."""
    scale = gamma / jnp.sqrt(var + eps)
    shift = beta - mean * scale
    xb = x_nchw * scale[None, :, None, None] + shift[None, :, None, None]
    w2 = conv_w.reshape(conv_w.shape[0], conv_w.shape[1])              # (Cout, Cin)
    z = jnp.einsum('nchw,oc->nohw', xb, w2) + conv_b[None, :, None, None]
    N, C, H, W = z.shape
    return z.reshape(N, C, H // 2, 2, W // 2, 2).mean(axis=(3, 5))


if __name__ == "__main__":
    N, Cin, Cout, H, W = 2, 4, 8, 16, 16

    key = jax.random.PRNGKey(0)
    kx, kg, kb, km, kv, kw, kc = jax.random.split(key, 7)

    x = jax.random.normal(kx, (N, Cin, H, W), dtype=jnp.float32)
    gamma = jax.random.normal(kg, (Cin,), dtype=jnp.float32) * 0.1 + 1.0
    beta = jax.random.normal(kb, (Cin,), dtype=jnp.float32) * 0.1
    running_mean = jax.random.normal(km, (Cin,), dtype=jnp.float32) * 0.1
    running_var = jnp.abs(jax.random.normal(kv, (Cin,), dtype=jnp.float32)) + 0.5
    conv_w = jax.random.normal(kw, (Cout, Cin, 1, 1), dtype=jnp.float32) * 0.2
    conv_b = jax.random.normal(kc, (Cout,), dtype=jnp.float32) * 0.1

    out = transition_layer(x, gamma, beta, running_mean, running_var, conv_w, conv_b)
    out = jax.block_until_ready(out)

    ref = _reference(x, gamma, beta, running_mean, running_var, conv_w, conv_b)
    assert out.shape == (N, Cout, H // 2, W // 2), out.shape
    assert jnp.allclose(out, ref, rtol=1e-4, atol=1e-4), float(jnp.max(jnp.abs(out - ref)))

    print("KERNEL_OK")
</pallas_src>

<mosaic_0001>
module attributes {stable_mosaic.version = 11 : i64} {
  func.func @_transition_kernel(%arg0: i32, %arg1: i32, %arg2: memref<1x16x16x4xf32, #tpu.memory_space<vmem>>, %arg3: memref<4x8xf32, #tpu.memory_space<vmem>>, %arg4: memref<1x8xf32, #tpu.memory_space<vmem>>, %arg5: memref<1x8x8x8xf32, #tpu.memory_space<vmem>>) attributes {dimension_semantics = [#tpu.dimension_semantics<parallel>, #tpu.dimension_semantics<parallel>], iteration_bounds = array<i64: 2, 1>, scalar_prefetch = 0 : i64, scratch_operands = 0 : i64, tpu.core_type = #tpu.core_type<tc>, window_params = [{transform_indices = @transform_0, window_bounds = array<i64: 1, 16, 16, 4>}, {pipeline_mode = #tpu.pipeline_mode<synchronous>, transform_indices = @transform_1, window_bounds = array<i64: 4, 8>}, {pipeline_mode = #tpu.pipeline_mode<synchronous>, transform_indices = @transform_2, window_bounds = array<i64: 1, 8>}, {transform_indices = @transform_3, window_bounds = array<i64: 1, 8, 8, 8>}]} {
    %c0 = arith.constant 0 : index
    %c0_0 = arith.constant 0 : index
    %c0_1 = arith.constant 0 : index
    %c0_2 = arith.constant 0 : index
    %0 = vector.load %arg2[%c0, %c0_0, %c0_1, %c0_2] : memref<1x16x16x4xf32, #tpu.memory_space<vmem>>, vector<1x16x16x4xf32>
    %1 = vector.shape_cast %0 : vector<1x16x16x4xf32> to vector<16x16x4xf32>
    %2 = vector.shape_cast %1 : vector<16x16x4xf32> to vector<8x2x16x4xf32>
    %cst = arith.constant dense<0.000000e+00> : vector<8x16x4xf32>
    %3 = vector.multi_reduction <add>, %2, %cst [1] : vector<8x2x16x4xf32> to vector<8x16x4xf32>
    %4 = vector.shape_cast %3 : vector<8x16x4xf32> to vector<8x8x2x4xf32>
    %cst_3 = arith.constant dense<0.000000e+00> : vector<8x8x4xf32>
    %5 = vector.multi_reduction <add>, %4, %cst_3 [2] : vector<8x8x2x4xf32> to vector<8x8x4xf32>
    %6 = vector.shape_cast %5 : vector<8x8x4xf32> to vector<64x4xf32>
    %c0_4 = arith.constant 0 : index
    %c0_5 = arith.constant 0 : index
    %7 = vector.load %arg3[%c0_4, %c0_5] : memref<4x8xf32, #tpu.memory_space<vmem>>, vector<4x8xf32>
    %cst_6 = arith.constant dense<0.000000e+00> : vector<64x8xf32>
    %8 = tpu.matmul %6, %7, %cst_6 {dimension_numbers = #tpu.dot_dimension_numbers<[1], [0], [0], [1], [0, 0, 1, 1], [], []>} : vector<64x4xf32>, vector<4x8xf32>, vector<64x8xf32> -> vector<64x8xf32>
    %c0_7 = arith.constant 0 : index
    %c0_8 = arith.constant 0 : index
    %9 = vector.load %arg4[%c0_7, %c0_8] : memref<1x8xf32, #tpu.memory_space<vmem>>, vector<1x8xf32>
    %10 = vector.broadcast %9 : vector<1x8xf32> to vector<64x8xf32>
    %11 = arith.addf %8, %10 : vector<64x8xf32>
    %12 = vector.shape_cast %11 : vector<64x8xf32> to vector<8x8x8xf32>
    %c0_9 = arith.constant 0 : index
    %c0_10 = arith.constant 0 : index
    %c0_11 = arith.constant 0 : index
    %c0_12 = arith.constant 0 : index
    %13 = vector.load %arg5[%c0_9, %c0_10, %c0_11, %c0_12] : memref<1x8x8x8xf32, #tpu.memory_space<vmem>>, vector<1x8x8x8xf32>
    %14 = vector.shape_cast %13 : vector<1x8x8x8xf32> to vector<8x8x8xf32>
    %15 = vector.shape_cast %12 : vector<8x8x8xf32> to vector<1x8x8x8xf32>
    tpu.vector_store %arg5[%c0_9, %c0_10, %c0_11, %c0_12], %15 {strides = array<i32>} : memref<1x8x8x8xf32, #tpu.memory_space<vmem>>, vector<1x8x8x8xf32>,
    return
  }
  func.func @transform_0(%arg0: i32, %arg1: i32) -> (i32, i32, i32, i32) {
    %c0_i32 = arith.constant 0 : i32
    %c0_i32_0 = arith.constant 0 : i32
    %c0_i32_1 = arith.constant 0 : i32
    return %arg0, %arg1, %c0_i32, %c0_i32_0 : i32, i32, i32, i32
  }
  func.func @transform_1(%arg0: i32, %arg1: i32) -> (i32, i32) {
    %c0_i32 = arith.constant 0 : i32
    %c0_i32_0 = arith.constant 0 : i32
    %c0_i32_1 = arith.constant 0 : i32
    return %c0_i32, %c0_i32_0 : i32, i32
  }
  func.func @transform_2(%arg0: i32, %arg1: i32) -> (i32, i32) {
    %c0_i32 = arith.constant 0 : i32
    %c0_i32_0 = arith.constant 0 : i32
    %c0_i32_1 = arith.constant 0 : i32
    return %c0_i32, %c0_i32_0 : i32, i32
  }
  func.func @transform_3(%arg0: i32, %arg1: i32) -> (i32, i32, i32, i32) {
    %c0_i32 = arith.constant 0 : i32
    %c0_i32_0 = arith.constant 0 : i32
    %c0_i32_1 = arith.constant 0 : i32
    return %arg0, %arg1, %c0_i32, %c0_i32_0 : i32, i32, i32, i32
  }
}

</mosaic_0001>

<bundles_post_ra>
// kernel: tpu_custom_call.1
= control target key start
LH: loop header
LB: loop body
LE: loop exit
PB: predicated region body
PF: predicated region fallthrough
CT: control target
= control target key end

     0   :  { %8 = vsyncpa [#allocation3], 0  ;;  %s2064_s0 = inlined_call_operand.vmem [shape: f32[2,16,16,4], index: 0, kind: input, shape index: {}]   ;;  %s2065_s1 = inlined_call_operand.vmem [shape: f32[4,8], index: 1, kind: input, shape index: {}]   ;;  %s2066_s2 = inlined_call_operand.vmem [shape: f32[1,8], index: 2, kind: input, shape index: {}]   ;;  %s2067_s3 = inlined_call_operand.hbm [shape: f32[2,8,8,8], index: 3, kind: output, shape index: {}]  }
   0x1   :  { %10 = vsyncpa [#allocation3 + $0x1], 0  ;;  %s1662_s12 = smov 0   ;;  %s1664_s13 = smov 0  }
   0x2   :  { %s1666_s14 = smov 0   ;;  %s1668_s15 = smov 0  }
   0x3   :  { %s1670_s16 = smov 0   ;;  %s1672_s17 = smov 0  }
   0x4 LB: > { %s1452_s18 = sadd.s32 4294967295, %s1636_s17   ;;  %s1453_s19 = sadd.s32 4294967294, %s1636_s17   ;;  %s1636_s17 = sphi %s1672_s17, %s16_s17   ;;  %s1632_s16 = sphi %s1670_s16, %s2074_s16   ;;  %s1628_s15 = sphi %s1668_s15, %s2073_s15   ;;  %s1624_s14 = sphi %s1666_s14, %s2072_s14   ;;  %s1620_s13 = sphi %s1664_s13, %s2071_s13   ;;  %s1616_s12 = sphi %s1662_s12, %s2070_s12  }
   0x5   : > { %s28_s20 = sadd.s32 1, %s1632_s16  ;;  %s107_s21 = sadd.s32 1, %s1624_s14 }
   0x6   : > { %p30_p0 = scmp.ge.s32.totalorder %s28_s20, 2  ;;  %p117_p1 = scmp.ne.s32.totalorder %s1624_s14, %s1620_s13 }
   0x7   : > { %p118_p2 = scmp.eq.s32.totalorder %s1452_s18, 1  ;;  %p123_p3 = scmp.ne.s32.totalorder %s1620_s13, %s1616_s12 }
   0x8   : > { %s2076_s20 = smov (%p30_p0, %s28_s20), 0  ;;  %p124_p5 = scmp.eq.s32.totalorder %s1453_s19, 1 }
   0x9   : > { %p1702_p4 = por %p118_p2, %p117_p1  ;;  %s102_s23 = ssub.s32 %s1632_s16, %s2076_s20 }
   0xa   : > { %p1456_p6 = scmp.ge.s32.totalorder %s1636_s17, 1  ;;  %p105_p7 = scmp.eq.s32.totalorder %s102_s23, 0 }
   0xb   : > { %p1709_p8 = por %p124_p5, %p123_p3  ;;  %p162_p9 = scmp.lt.s32.totalorder %s1636_s17, 3 }
   0xc   : > { %s1715_s25 = scalar_select %p105_p7, %s1624_s14, %s107_s21  }
   0xd   : > { %p163_p10 = pnand %p1456_p6, %p162_p9 }
   0xe   : > { %p192_p11 = scmp.lt.s32.totalorder (!%p163_p10), %s1628_s15, 1  ;;  %s188_s6 = sand.u32 (!%p163_p10), 1, %s1620_s13  }
   0xf   : > { %166 = sbr.rel (%p163_p10) target bundleno = 399 (0x18f), region = 32  ;;  %s1457_s7 = sshll.u32 (!%p163_p10), %s188_s6, 6 }
  0x10   : > { %s190_s10 = scalar_lea.vmem (!%p163_p10), [#allocation2], %s1457_s7  ;;  %s1476_s11 = sshll.u32 (!%p163_p10), %s1628_s15, 10 }
  0x11   : > { %s1370_s18 = sshll.u32 (!%p163_p10), %s190_s10, 4  ;;  %s2011_s23 = scalar_lea.hbm (!%p163_p10), %s2067_s3, %s1476_s11  ;;  %s2013_s18 = int_to_ptr.vmem [resolvable:$true] %s1370_s18 }
  0x12   : > { %s1560_s26 = scalar_lea.vmem (!%p163_p10), %s2013_s18, 1024  ;;  %s1639_s27 = smov (!%p163_p10), [#allocation2]  }
  0x13   : > { %p1561_p12 = scmp.ne.s32.totalorder (!%p163_p10), %s2013_s18, %s1560_s26 }
  0x14   : > { %v1085_v0 = vld [vmem:[%s2065_s1] sm:$0xf]  ;;  %vm1236_vm0 = vcmask 1043456   ;;  %v304_v1 = vlaneseq  ;;  %s193_s28 = scalar_select %p192_p11, %s1628_s15, 1  ;;  %v1638_v2 = vmov 1983009808  }
  0x15   : > { %1486 = vmatprep.subr.msk.mxu0 %vm1236_vm0, %v1085_v0  ;;  %1500 = vmatprep.subr.msk.mxu1 %vm1236_vm0, %v1085_v0  ;;  %v302_v3 = vunpack.c.l.s4 %v1638_v2  ;;  %vm235_vm1 = vcmask 31744   ;;  %vm636_vm2 = vcmask 25600   ;;  %vm1157_vm3 = vcmask 1041409   ;;  %s2019_s15 = scalar_lea.sflag [#allocation3], %s188_s6  ;;  %p1562_p13 = pnand %p1561_p12, %p1702_p4 }
  0x16   : > { %1487 = vmatpush3.msk.msra.mxu0 %vm1236_vm0, %v1085_v0  ;;  %1501 = vmatpush3.msk.msra.mxu1 %vm1236_vm0, %v1085_v0  ;;  %v305_v4 = vshrl.u32 %v304_v1, 7  ;;  %s1475_s29 = sshll.u32 %s193_s28, 8  ;;  %vm1159_vm4 = vcmask 1042434   ;;  %vm1161_vm5 = vcmask 1043459   ;;  %vm1163_vm6 = vcmask 1044484   ;;  %s1564_s28 = sshll.u32 %s1639_s27, 4  ;;  %s1565_s28 = int_to_ptr.vmem [resolvable:$false] %s1564_s28 }
  0x17   : > { %v303_v5 = vunpack.c.0.s8 %v302_v3  ;;  %s1725_s5 = scalar_lea.vmem %s2064_s0, %s1475_s29  ;;  %vm1165_vm7 = vcmask 1045509   ;;  %vm1167_vm8 = vcmask 1046534   ;;  %vm1169_vm9 = vcmask 1047559   ;;  %p1563_p0 = pneg %p1562_p13 }
  0x18   : > { %v203_v6 = vld [vmem:[%s1725_s5] sm:$0xff]  ;;  %v204_v7 = vld [vmem:[%s1725_s5 + $0x8] sm:$0xff]  ;;  %v205_v8 = vld [vmem:[%s1725_s5 + $0x10] sm:$0xff]  ;;  %vm1345_vm10 = vcmask 64512   ;;  %s1566_s29 = scalar_lea.vmem %s1565_s28, 2048  ;;  %p1567_p1 = scmp.lt.s32.totalorder %s2013_s18, %s1565_s28 }
  0x19   : > { %v1730_v9 = vsub.s32 %v303_v5, %v305_v4  ;;  %v206_v10 = vld [vmem:[%s1725_s5 + $0x18] sm:$0xff]  ;;  %v236_v11 = vsel %vm235_vm1, %v203_v6, 0.0  ;;  %v237_v12 = vsel %vm235_vm1, %v205_v8, 0.0  ;;  %v239_v13 = vsel %vm235_vm1, %v204_v7, 0.0  ;;  %v219_v14 = vld [vmem:[%s1725_s5 + $0x80] sm:$0xff]  ;;  %v220_v15 = vld [vmem:[%s1725_s5 + $0x88] sm:$0xff]  ;;  %p1568_p2 = scmp.lt.s32.totalorder %s1566_s29, %s1560_s26 }
  0x1a   : > { %v238_v16 = vadd.f32 %v237_v12, %v236_v11  ;;  %v240_v17 = vsel %vm235_vm1, %v206_v10, 0.0  ;;  %v221_v18 = vld [vmem:[%s1725_s5 + $0x90] sm:$0xff]  ;;  %v222_v19 = vld [vmem:[%s1725_s5 + $0x98] sm:$0xff]  ;;  %v260_v20 = vsel %vm235_vm1, %v219_v14, 0.0  ;;  %v263_v21 = vsel %vm235_vm1, %v220_v15, 0.0  ;;  %v207_v22 = vld [vmem:[%s1725_s5 + $0x20] sm:$0xff] }
  0x1b   : > { %v241_v23 = vadd.f32 %v240_v17, %v239_v13  ;;  %v261_v24 = vsel %vm235_vm1, %v221_v18, 0.0  ;;  %v264_v25 = vsel %vm235_vm1, %v222_v19, 0.0  ;;  %v208_v26 = vld [vmem:[%s1725_s5 + $0x28] sm:$0xff]  ;;  %v209_v27 = vld [vmem:[%s1725_s5 + $0x30] sm:$0xff]  ;;  %v1749_v28 = vsel %vm235_vm1, %v207_v22, 0.0  ;;  %p1569_p3 = por %p1568_p2, %p1567_p1 }
  0x1c   : > { %v300_v29 = vcombine.high %v238_v16, %v238_v16  ;;  %v307_v30 = vrot.slane %v238_v16, %v1730_v9  ;;  %v1752_v31 = vadd.f32 %v261_v24, %v260_v20  ;;  %v1754_v32 = vadd.f32 %v264_v25, %v263_v21 }
  0x1d   : > { %v317_v33 = vcombine.high %v241_v23, %v241_v23  ;;  %v324_v34 = vrot.slane %v241_v23, %v1730_v9  ;;  %v1758_v35 = vsel %vm235_vm1, %v209_v27, 0.0  ;;  %v1761_v36 = vsel %vm235_vm1, %v208_v26, 0.0  ;;  %p1570_p5 = pnand %p1569_p3, %p1563_p0 }
  0x1e   : > { %v314_v37 = vrot.slane %v300_v29, %v1730_v9  ;;  %v315_v38 = vcombine.high %v307_v30, %v307_v30  ;;  %v637_v39 = vsel %vm636_vm2, %v307_v30, 0.0  ;;  %v436_v40 = vcombine.high %v1752_v31, %v1752_v31 }
  0x1f   : > { %v331_v41 = vrot.slane %v317_v33, %v1730_v9  ;;  %v332_v42 = vcombine.high %v324_v34, %v324_v34  ;;  %v638_v43 = vrot.slane %v637_v39, 4  ;;  %v665_v44 = vsel %vm636_vm2, %v324_v34, 0.0 }
  0x20   : > { %v316_v45 = vcombine.high %v314_v37, %v314_v37  ;;  %v644_v46 = vsel %vm636_vm2, %v315_v38, 0.0  ;;  %v651_v47 = vsel %vm636_vm2, %v314_v37, 0.0  ;;  %v666_v48 = vrot.slane %v665_v44, 4 }
  0x21   : > { %v333_v49 = vcombine.high %v331_v41, %v331_v41  ;;  %v639_v50 = vadd.f32 %v638_v43, %v637_v39  ;;  %v645_v51 = vrot.slane %v644_v46, 4  ;;  %v652_v52 = vrot.slane %v651_v47, 4 }
  0x22   : > { %v658_v53 = vsel %vm636_vm2, %v316_v45, 0.0  ;;  %v667_v54 = vadd.f32 %v666_v48, %v665_v44  ;;  %v672_v55 = vsel %vm636_vm2, %v332_v42, 0.0  ;;  %v679_v56 = vsel %vm636_vm2, %v331_v41, 0.0 }
  0x23   : > { %v640_v57 = vrot.slane %v639_v50, 2  ;;  %v646_v58 = vadd.f32 %v645_v51, %v644_v46  ;;  %v653_v59 = vadd.f32 %v652_v52, %v651_v47  ;;  %v659_v60 = vrot.slane %v658_v53, 4 }
  0x24   : > { %v668_v61 = vrot.slane %v667_v54, 2  ;;  %v673_v62 = vrot.slane %v672_v55, 4  ;;  %v680_v63 = vrot.slane %v679_v56, 4  ;;  %v686_v0 = vsel %vm636_vm2, %v333_v49, 0.0 }
  0x25   : > { %v641_v1 = vadd.f32 %v640_v57, %v639_v50  ;;  %v647_v2 = vrot.slane %v646_v58, 2  ;;  %v654_v3 = vrot.slane %v653_v59, 2  ;;  %v660_v4 = vadd.f32 %v659_v60, %v658_v53 }
  0x26   : > { %v669_v5 = vadd.f32 %v668_v61, %v667_v54  ;;  %v674_v6 = vadd.f32 %v673_v62, %v672_v55  ;;  %v681_v7 = vadd.f32 %v680_v63, %v679_v56  ;;  %v687_v8 = vrot.slane %v686_v0, 4 }
  0x27   : > { %v642_v10 = vrot.slane %v641_v1, 1  ;;  %v648_v11 = vadd.f32 %v647_v2, %v646_v58  ;;  %v655_v12 = vadd.f32 %v654_v3, %v653_v59  ;;  %v661_v13 = vrot.slane %v660_v4, 2 }
  0x28   : > { %v670_v14 = vrot.slane %v669_v5, 1  ;;  %v675_v15 = vrot.slane %v674_v6, 2  ;;  %v682_v16 = vrot.slane %v681_v7, 2  ;;  %v688_v17 = vadd.f32 %v687_v8, %v686_v0 }
  0x29   : > { %v643_v18 = vadd.f32 %v642_v10, %v641_v1  ;;  %v649_v19 = vrot.slane %v648_v11, 1  ;;  %v656_v20 = vrot.slane %v655_v12, 1  ;;  %v662_v21 = vadd.f32 %v661_v13, %v660_v4 }
  0x2a   : > { %v671_v22 = vadd.f32 %v670_v14, %v669_v5  ;;  %v676_v23 = vadd.f32 %v675_v15, %v674_v6  ;;  %v683_v24 = vadd.f32 %v682_v16, %v681_v7  ;;  %v689_v25 = vrot.slane %v688_v17, 2 }
  0x2b   : > { %v650_v26 = vadd.f32 %v649_v19, %v648_v11  ;;  %v657_v27 = vadd.f32 %v656_v20, %v655_v12  ;;  %v663_v29 = vrot.slane %v662_v21, 1  ;;  %v443_v30 = vrot.slane %v1752_v31, %v1730_v9 }
  0x2c   : > { %v677_v33 = vrot.slane %v676_v23, 1  ;;  %v684_v34 = vrot.slane %v683_v24, 1  ;;  %v690_v37 = vadd.f32 %v689_v25, %v688_v17  ;;  %v450_v38 = vrot.slane %v436_v40, %v1730_v9 }
  0x2d   : > { %v664_v39 = vadd.f32 %v663_v29, %v662_v21  ;;  %v1158_v41 = vsel %vm1157_vm3, %v650_v26, %v643_v18  ;;  %v451_v42 = vcombine.high %v443_v30, %v443_v30  ;;  %v453_v43 = vcombine.high %v1754_v32, %v1754_v32 }
  0x2e   : > { %v678_v44 = vadd.f32 %v677_v33, %v676_v23  ;;  %v685_v45 = vadd.f32 %v684_v34, %v683_v24  ;;  %v691_v46 = vrot.slane %v690_v37, 1  ;;  %v1160_v47 = vsel %vm1159_vm4, %v657_v27, %v1158_v41 }
  0x2f   : > { %v1162_v48 = vsel %vm1161_vm5, %v664_v39, %v1160_v47  ;;  %v452_v49 = vcombine.high %v450_v38, %v450_v38  ;;  %v460_v50 = vrot.slane %v1754_v32, %v1730_v9  ;;  %v467_v31 = vrot.slane %v453_v43, %v1730_v9 }
  0x30   : > { %v692_v40 = vadd.f32 %v691_v46, %v690_v37  ;;  %v1164_v51 = vsel %vm1163_vm6, %v671_v22, %v1162_v48  ;;  %v861_v52 = vsel %vm636_vm2, %v443_v30, 0.0  ;;  %v868_v53 = vsel %vm636_vm2, %v451_v42, 0.0 }
  0x31   : > { %v1166_v54 = vsel %vm1165_vm7, %v678_v44, %v1164_v51  ;;  %v468_v55 = vcombine.high %v460_v50, %v460_v50  ;;  %v469_v56 = vcombine.high %v467_v31, %v467_v31  ;;  %v862_v57 = vrot.slane %v861_v52, 4  ;;  %v210_v44 = vld [vmem:[%s1725_s5 + $0x38] sm:$0xff] }
  0x32   : > { %v1168_v58 = vsel %vm1167_vm8, %v685_v45, %v1166_v54  ;;  %v869_v59 = vrot.slane %v868_v53, 4  ;;  %v875_v60 = vsel %vm636_vm2, %v450_v38, 0.0  ;;  %v882_v32 = vsel %vm636_vm2, %v452_v49, 0.0 }
  0x33   : > { %v1170_v61 = vsel %vm1169_vm9, %v692_v40, %v1168_v58  ;;  %v863_v62 = vadd.f32 %v862_v57, %v861_v52  ;;  %v876_v63 = vrot.slane %v875_v60, 4  ;;  %v883_v0 = vrot.slane %v882_v32, 4 }
  0x34   : > { %1488 = vmatprep.mubr.msk.f32.mxu0 %vm235_vm1, %v1170_v61  ;;  %v870_v1 = vadd.f32 %v869_v59, %v868_v53  ;;  %v889_v2 = vsel %vm636_vm2, %v460_v50, 0.0  ;;  %v896_v3 = vsel %vm636_vm2, %v468_v55, 0.0  ;;  %v903_v4 = vsel %vm636_vm2, %v467_v31, 0.0  ;;  %v223_v55 = vld [vmem:[%s1725_s5 + $0xa0] sm:$0xff] }
  0x35   : > { %v864_v5 = vrot.slane %v863_v62, 2  ;;  %v877_v6 = vadd.f32 %v876_v63, %v875_v60  ;;  %v884_v7 = vadd.f32 %v883_v0, %v882_v32  ;;  %v890_v8 = vrot.slane %v889_v2, 4 }
  0x36   : > { %v871_v10 = vrot.slane %v870_v1, 2  ;;  %v897_v11 = vrot.slane %v896_v3, 4  ;;  %v904_v12 = vrot.slane %v903_v4, 4  ;;  %v910_v13 = vsel %vm636_vm2, %v469_v56, 0.0  ;;  %v225_v56 = vld [vmem:[%s1725_s5 + $0xb0] sm:$0xff] }
  0x37   : > { %v865_v14 = vadd.f32 %v864_v5, %v863_v62  ;;  %v878_v15 = vrot.slane %v877_v6, 2  ;;  %v885_v16 = vrot.slane %v884_v7, 2  ;;  %v891_v17 = vadd.f32 %v890_v8, %v889_v2 }
  0x38   : > { %v872_v18 = vadd.f32 %v871_v10, %v870_v1  ;;  %v898_v19 = vadd.f32 %v897_v11, %v896_v3  ;;  %v905_v20 = vadd.f32 %v904_v12, %v903_v4  ;;  %v911_v21 = vrot.slane %v910_v13, 4 }
  0x39   : > { %v866_v22 = vrot.slane %v865_v14, 1  ;;  %v879_v23 = vadd.f32 %v878_v15, %v877_v6  ;;  %v886_v24 = vadd.f32 %v885_v16, %v884_v7  ;;  %v892_v25 = vrot.slane %v891_v17, 2 }
  0x3a   : > { %v873_v26 = vrot.slane %v872_v18, 1  ;;  %v899_v27 = vrot.slane %v898_v19, 2  ;;  %v906_v29 = vrot.slane %v905_v20, 2  ;;  %v912_v30 = vadd.f32 %v911_v21, %v910_v13 }
  0x3b   : > { %v867_v33 = vadd.f32 %v866_v22, %v865_v14  ;;  %v880_v34 = vrot.slane %v879_v23, 1  ;;  %v887_v37 = vrot.slane %v886_v24, 1  ;;  %v893_v38 = vadd.f32 %v892_v25, %v891_v17 }
  0x3c   : > { %v874_v39 = vadd.f32 %v873_v26, %v872_v18  ;;  %v900_v41 = vadd.f32 %v899_v27, %v898_v19  ;;  %v907_v42 = vadd.f32 %v906_v29, %v905_v20  ;;  %v913_v43 = vrot.slane %v912_v30, 2 }
  0x3d   : > { %v881_v45 = vadd.f32 %v880_v34, %v879_v23  ;;  %v888_v46 = vadd.f32 %v887_v37, %v886_v24  ;;  %v894_v47 = vrot.slane %v893_v38, 1  ;;  %v244_v48 = vadd.f32 %v1758_v35, %v1749_v28 }
  0x3e   : > { %v901_v49 = vrot.slane %v900_v41, 1  ;;  %v908_v50 = vrot.slane %v907_v42, 1  ;;  %v914_v31 = vadd.f32 %v913_v43, %v912_v30  ;;  %v1192_v40 = vsel %vm1157_vm3, %v874_v39, %v867_v33 }
  0x3f   : > { %v895_v51 = vadd.f32 %v894_v47, %v893_v38  ;;  %v1193_v52 = vsel %vm1159_vm4, %v881_v45, %v1192_v40  ;;  %v246_v53 = vsel %vm235_vm1, %v210_v44, 0.0  ;;  %v334_v54 = vcombine.high %v244_v48, %v244_v48 }
  0x40   : > { %v902_v57 = vadd.f32 %v901_v49, %v900_v41  ;;  %v909_v58 = vadd.f32 %v908_v50, %v907_v42  ;;  %v915_v59 = vrot.slane %v914_v31, 1  ;;  %v1194_v60 = vsel %vm1161_vm5, %v888_v46, %v1193_v52 }
  0x41   : > { %v1195_v28 = vsel %vm1163_vm6, %v895_v51, %v1194_v60  ;;  %v247_v35 = vadd.f32 %v246_v53, %v1761_v36  ;;  %v341_v32 = vrot.slane %v244_v48, %v1730_v9  ;;  %v348_v61 = vrot.slane %v334_v54, %v1730_v9  ;;  %v224_v54 = vld [vmem:[%s1725_s5 + $0xa8] sm:$0xff] }
  0x42   : > { %v916_v62 = vadd.f32 %v915_v59, %v914_v31  ;;  %v1196_v63 = vsel %vm1165_vm7, %v902_v57, %v1195_v28  ;;  %v1817_v0 = vsel %vm235_vm1, %v223_v55, 0.0  ;;  %v267_v1 = vsel %vm235_vm1, %v225_v56, 0.0 }
  0x43   : > { %v1197_v2 = vsel %vm1167_vm8, %v909_v58, %v1196_v63  ;;  %v349_v3 = vcombine.high %v341_v32, %v341_v32  ;;  %v350_v4 = vcombine.high %v348_v61, %v348_v61  ;;  %v351_v5 = vcombine.high %v247_v35, %v247_v35 }
  0x44   : > { %v1198_v6 = vsel %vm1169_vm9, %v916_v62, %v1197_v2  ;;  %v358_v36 = vrot.slane %v247_v35, %v1730_v9  ;;  %v693_v7 = vsel %vm636_vm2, %v341_v32, 0.0  ;;  %v707_v8 = vsel %vm636_vm2, %v348_v61, 0.0  ;;  %v226_v32 = vld [vmem:[%s1725_s5 + $0xb8] sm:$0xff] }
  0x45   : > { %1494 = vmatprep.mubr.msk.f32.mxu1 %vm235_vm1, %v1198_v6  ;;  %v365_v10 = vrot.slane %v351_v5, %v1730_v9  ;;  %v694_v11 = vrot.slane %v693_v7, 4  ;;  %v700_v12 = vsel %vm636_vm2, %v349_v3, 0.0  ;;  %v708_v13 = vrot.slane %v707_v8, 4 }
  0x46   : > { %v366_v14 = vcombine.high %v358_v36, %v358_v36  ;;  %v701_v15 = vrot.slane %v700_v12, 4  ;;  %v714_v16 = vsel %vm636_vm2, %v350_v4, 0.0  ;;  %v721_v17 = vsel %vm636_vm2, %v358_v36, 0.0  ;;  %v211_v36 = vld [vmem:[%s1725_s5 + $0x40] sm:$0xff] }
  0x47   : > { %v367_v18 = vcombine.high %v365_v10, %v365_v10  ;;  %v695_v19 = vadd.f32 %v694_v11, %v693_v7  ;;  %v709_v20 = vadd.f32 %v708_v13, %v707_v8  ;;  %v715_v21 = vrot.slane %v714_v16, 4 }
  0x48   : > { %v702_v22 = vadd.f32 %v701_v15, %v700_v12  ;;  %v722_v23 = vrot.slane %v721_v17, 4  ;;  %v728_v24 = vsel %vm636_vm2, %v366_v14, 0.0  ;;  %v735_v25 = vsel %vm636_vm2, %v365_v10, 0.0 }
  0x49   : > { %v696_v26 = vrot.slane %v695_v19, 2  ;;  %v710_v27 = vrot.slane %v709_v20, 2  ;;  %v716_v29 = vadd.f32 %v715_v21, %v714_v16  ;;  %v729_v30 = vrot.slane %v728_v24, 4 }
  0x4a   : > { %v703_v33 = vrot.slane %v702_v22, 2  ;;  %v723_v34 = vadd.f32 %v722_v23, %v721_v17  ;;  %v736_v37 = vrot.slane %v735_v25, 4  ;;  %v742_v38 = vsel %vm636_vm2, %v367_v18, 0.0 }
  0x4b   : > { %v697_v39 = vadd.f32 %v696_v26, %v695_v19  ;;  %v711_v41 = vadd.f32 %v710_v27, %v709_v20  ;;  %v717_v42 = vrot.slane %v716_v29, 2  ;;  %v730_v43 = vadd.f32 %v729_v30, %v728_v24 }
  0x4c   : > { %v704_v44 = vadd.f32 %v703_v33, %v702_v22  ;;  %v724_v45 = vrot.slane %v723_v34, 2  ;;  %v737_v46 = vadd.f32 %v736_v37, %v735_v25  ;;  %v743_v47 = vrot.slane %v742_v38, 4 }
  0x4d   : > { %v698_v48 = vrot.slane %v697_v39, 1  ;;  %v712_v49 = vrot.slane %v711_v41, 1  ;;  %v718_v50 = vadd.f32 %v717_v42, %v716_v29  ;;  %v731_v31 = vrot.slane %v730_v43, 2 }
  0x4e   : > { %v705_v40 = vrot.slane %v704_v44, 1  ;;  %v725_v51 = vadd.f32 %v724_v45, %v723_v34  ;;  %v738_v52 = vrot.slane %v737_v46, 2  ;;  %v744_v53 = vadd.f32 %v743_v47, %v742_v38 }
  0x4f   : > { %v699_v55 = vadd.f32 %v698_v48, %v697_v39  ;;  %v713_v56 = vadd.f32 %v712_v49, %v711_v41  ;;  %v719_v57 = vrot.slane %v718_v50, 1  ;;  %v732_v58 = vadd.f32 %v731_v31, %v730_v43 }
  0x50   : > { %v706_v59 = vadd.f32 %v705_v40, %v704_v44  ;;  %v726_v60 = vrot.slane %v725_v51, 1  ;;  %v739_v28 = vadd.f32 %v738_v52, %v737_v46  ;;  %v745_v35 = vrot.slane %v744_v53, 2 }
  0x51   : > { %v720_v61 = vadd.f32 %v719_v57, %v718_v50  ;;  %v733_v62 = vrot.slane %v732_v58, 1  ;;  %v268_v63 = vadd.f32 %v267_v1, %v1817_v0  ;;  %v269_v2 = vsel %vm235_vm1, %v224_v54, 0.0 }
  0x52   : > { %v727_v3 = vadd.f32 %v726_v60, %v725_v51  ;;  %v740_v4 = vrot.slane %v739_v28, 1  ;;  %v746_v5 = vadd.f32 %v745_v35, %v744_v53  ;;  %v1171_v6 = vsel %vm1157_vm3, %v706_v59, %v699_v55 }
  0x53   : > { %v734_v7 = vadd.f32 %v733_v62, %v732_v58  ;;  %v1172_v8 = vsel %vm1159_vm4, %v713_v56, %v1171_v6  ;;  %v270_v10 = vsel %vm235_vm1, %v226_v32, 0.0  ;;  %v470_v11 = vcombine.high %v268_v63, %v268_v63 }
  0x54   : > { %v741_v12 = vadd.f32 %v740_v4, %v739_v28  ;;  %v747_v13 = vrot.slane %v746_v5, 1  ;;  %v1173_v14 = vsel %vm1161_vm5, %v720_v61, %v1172_v8  ;;  %v271_v15 = vadd.f32 %v270_v10, %v269_v2 }
  0x55   : > { %v1174_v0 = vsel %vm1163_vm6, %v727_v3, %v1173_v14  ;;  %v477_v1 = vrot.slane %v268_v63, %v1730_v9  ;;  %v484_v16 = vrot.slane %v470_v11, %v1730_v9  ;;  %v1846_v17 = vsel %vm235_vm1, %v211_v36, 0.0  ;;  %v212_v14 = vld [vmem:[%s1725_s5 + $0x48] sm:$0xff] }
  0x56   : > { %v748_v18 = vadd.f32 %v747_v13, %v746_v5  ;;  %v1175_v19 = vsel %vm1165_vm7, %v734_v7, %v1174_v0  ;;  %v487_v20 = vcombine.high %v271_v15, %v271_v15  ;;  %v494_v21 = vrot.slane %v271_v15, %v1730_v9  ;;  %v213_v5 = vld [vmem:[%s1725_s5 + $0x50] sm:$0xff] }
  0x57   : > { %v1176_v22 = vsel %vm1167_vm8, %v741_v12, %v1175_v19  ;;  %v485_v23 = vcombine.high %v477_v1, %v477_v1  ;;  %v486_v24 = vcombine.high %v484_v16, %v484_v16  ;;  %v917_v25 = vsel %vm636_vm2, %v477_v1, 0.0 }
  0x58   : > { %v1177_v26 = vsel %vm1169_vm9, %v748_v18, %v1176_v22  ;;  %v501_v27 = vrot.slane %v487_v20, %v1730_v9  ;;  %v502_v29 = vcombine.high %v494_v21, %v494_v21  ;;  %v918_v30 = vrot.slane %v917_v25, 4 }
  0x59   : > { %1489 = vmatmul.mubr.msk.f32.vlgmr.msra.gmra.mxu0 %vm235_vm1, %v1177_v26  ;;  %v924_v33 = vsel %vm636_vm2, %v485_v23, 0.0  ;;  %v931_v34 = vsel %vm636_vm2, %v484_v16, 0.0  ;;  %v938_v37 = vsel %vm636_vm2, %v486_v24, 0.0  ;;  %v945_v38 = vsel %vm636_vm2, %v494_v21, 0.0  ;;  %v214_v16 = vld [vmem:[%s1725_s5 + $0x58] sm:$0xff] }
  0x5a   : > { %v503_v39 = vcombine.high %v501_v27, %v501_v27  ;;  %v919_v41 = vadd.f32 %v918_v30, %v917_v25  ;;  %v925_v42 = vrot.slane %v924_v33, 4  ;;  %v932_v43 = vrot.slane %v931_v34, 4 }
  0x5b   : > { %v939_v44 = vrot.slane %v938_v37, 4  ;;  %v946_v45 = vrot.slane %v945_v38, 4  ;;  %v952_v46 = vsel %vm636_vm2, %v502_v29, 0.0  ;;  %v959_v47 = vsel %vm636_vm2, %v501_v27, 0.0  ;;  %v227_v27 = vld [vmem:[%s1725_s5 + $0xc0] sm:$0xff]  ;;  %v229_v29 = vld [vmem:[%s1725_s5 + $0xd0] sm:$0xff] }
  0x5c   : > { %v920_v48 = vrot.slane %v919_v41, 2  ;;  %v926_v49 = vadd.f32 %v925_v42, %v924_v33  ;;  %v933_v50 = vadd.f32 %v932_v43, %v931_v34  ;;  %v953_v31 = vrot.slane %v952_v46, 4 }
  0x5d   : > { %v940_v40 = vadd.f32 %v939_v44, %v938_v37  ;;  %v947_v51 = vadd.f32 %v946_v45, %v945_v38  ;;  %v960_v52 = vrot.slane %v959_v47, 4  ;;  %v966_v53 = vsel %vm636_vm2, %v503_v39, 0.0 }
  0x5e   : > { %v921_v54 = vadd.f32 %v920_v48, %v919_v41  ;;  %v927_v55 = vrot.slane %v926_v49, 2  ;;  %v934_v56 = vrot.slane %v933_v50, 2  ;;  %v954_v57 = vadd.f32 %v953_v31, %v952_v46 }
  0x5f   : > { %v941_v58 = vrot.slane %v940_v40, 2  ;;  %v948_v59 = vrot.slane %v947_v51, 2  ;;  %v961_v60 = vadd.f32 %v960_v52, %v959_v47  ;;  %v967_v28 = vrot.slane %v966_v53, 4 }
  0x60   : > { %v922_v35 = vrot.slane %v921_v54, 1  ;;  %v928_v32 = vadd.f32 %v927_v55, %v926_v49  ;;  %v935_v61 = vadd.f32 %v934_v56, %v933_v50  ;;  %v955_v62 = vrot.slane %v954_v57, 2 }
  0x61   : > { %v942_v63 = vadd.f32 %v941_v58, %v940_v40  ;;  %v949_v2 = vadd.f32 %v948_v59, %v947_v51  ;;  %v962_v3 = vrot.slane %v961_v60, 2  ;;  %v968_v4 = vadd.f32 %v967_v28, %v966_v53 }
  0x62   : > { %v923_v6 = vadd.f32 %v922_v35, %v921_v54  ;;  %v929_v36 = vrot.slane %v928_v32, 1  ;;  %v936_v7 = vrot.slane %v935_v61, 1  ;;  %v956_v8 = vadd.f32 %v955_v62, %v954_v57 }
  0x63   : > { %v943_v10 = vrot.slane %v942_v63, 1  ;;  %v950_v11 = vrot.slane %v949_v2, 1  ;;  %v963_v12 = vadd.f32 %v962_v3, %v961_v60  ;;  %v969_v13 = vrot.slane %v968_v4, 2 }
  0x64   : > { %v930_v15 = vadd.f32 %v929_v36, %v928_v32  ;;  %v937_v0 = vadd.f32 %v936_v7, %v935_v61  ;;  %v957_v1 = vrot.slane %v956_v8, 1  ;;  %v249_v18 = vsel %vm235_vm1, %v213_v5, 0.0 }
  0x65   : > { %v944_v19 = vadd.f32 %v943_v10, %v942_v63  ;;  %v951_v20 = vadd.f32 %v950_v11, %v949_v2  ;;  %v964_v21 = vrot.slane %v963_v12, 1  ;;  %v970_v22 = vadd.f32 %v969_v13, %v968_v4 }
  0x66   : > { %v958_v23 = vadd.f32 %v957_v1, %v956_v8  ;;  %v1199_v24 = vsel %vm1157_vm3, %v930_v15, %v923_v6  ;;  %v250_v25 = vadd.f32 %v249_v18, %v1846_v17  ;;  %v251_v26 = vsel %vm235_vm1, %v212_v14, 0.0 }
  0x67   : > { %v965_v30 = vadd.f32 %v964_v21, %v963_v12  ;;  %v971_v33 = vrot.slane %v970_v22, 1  ;;  %v1200_v34 = vsel %vm1159_vm4, %v937_v0, %v1199_v24  ;;  %v252_v37 = vsel %vm235_vm1, %v214_v16, 0.0 }
  0x68   : > { %v1201_v38 = vsel %vm1161_vm5, %v944_v19, %v1200_v34  ;;  %v253_v39 = vadd.f32 %v252_v37, %v251_v26  ;;  %v368_v41 = vcombine.high %v250_v25, %v250_v25  ;;  %v375_v42 = vrot.slane %v250_v25, %v1730_v9  ;;  %v228_v26 = vld [vmem:[%s1725_s5 + $0xc8] sm:$0xff] }
  0x69   : > { %v972_v43 = vadd.f32 %v971_v33, %v970_v22  ;;  %v1202_v44 = vsel %vm1163_vm6, %v951_v20, %v1201_v38  ;;  %v272_v17 = vsel %vm235_vm1, %v227_v27, 0.0  ;;  %v273_v45 = vsel %vm235_vm1, %v229_v29, 0.0 }
  0x6a   : > { %v1203_v46 = vsel %vm1165_vm7, %v958_v23, %v1202_v44  ;;  %v382_v47 = vrot.slane %v368_v41, %v1730_v9  ;;  %v383_v48 = vcombine.high %v375_v42, %v375_v42  ;;  %v385_v49 = vcombine.high %v253_v39, %v253_v39  ;;  %v230_v41 = vld [vmem:[%s1725_s5 + $0xd8] sm:$0xff] }
  0x6b   : > { %v1204_v50 = vsel %vm1167_vm8, %v965_v30, %v1203_v46  ;;  %v392_v31 = vrot.slane %v253_v39, %v1730_v9  ;;  %v749_v40 = vsel %vm636_vm2, %v375_v42, 0.0  ;;  %v1883_v51 = vadd.f32 %v273_v45, %v272_v17 }
  0x6c   : > { %v1205_v52 = vsel %vm1169_vm9, %v972_v43, %v1204_v50  ;;  %v384_v53 = vcombine.high %v382_v47, %v382_v47  ;;  %v399_v54 = vrot.slane %v385_v49, %v1730_v9  ;;  %v750_v55 = vrot.slane %v749_v40, 4 }
  0x6d   : > { %1495 = vmatmul.mubr.msk.f32.vlgmr.msra.gmra.mxu1 %vm235_vm1, %v1205_v52  ;;  %v400_v56 = vcombine.high %v392_v31, %v392_v31  ;;  %v756_v57 = vsel %vm636_vm2, %v383_v48, 0.0  ;;  %v763_v58 = vsel %vm636_vm2, %v382_v47, 0.0  ;;  %v777_v59 = vsel %vm636_vm2, %v392_v31, 0.0  ;;  %v215_v52 = vld [vmem:[%s1725_s5 + $0x60] sm:$0xff] }
  0x6e   : > { %v401_v60 = vcombine.high %v399_v54, %v399_v54  ;;  %v751_v28 = vadd.f32 %v750_v55, %v749_v40  ;;  %v757_v35 = vrot.slane %v756_v57, 4  ;;  %v764_v32 = vrot.slane %v763_v58, 4 }
  0x6f   : > { %v770_v61 = vsel %vm636_vm2, %v384_v53, 0.0  ;;  %v778_v62 = vrot.slane %v777_v59, 4  ;;  %v784_v63 = vsel %vm636_vm2, %v400_v56, 0.0  ;;  %v791_v2 = vsel %vm636_vm2, %v399_v54, 0.0  ;;  %v217_v53 = vld [vmem:[%s1725_s5 + $0x70] sm:$0xff] }
  0x70   : > { %v752_v3 = vrot.slane %v751_v28, 2  ;;  %v758_v4 = vadd.f32 %v757_v35, %v756_v57  ;;  %v765_v5 = vadd.f32 %v764_v32, %v763_v58  ;;  %v771_v6 = vrot.slane %v770_v61, 4 }
  0x71   : > { %v779_v36 = vadd.f32 %v778_v62, %v777_v59  ;;  %v785_v7 = vrot.slane %v784_v63, 4  ;;  %v792_v8 = vrot.slane %v791_v2, 4  ;;  %v798_v10 = vsel %vm636_vm2, %v401_v60, 0.0 }
  0x72   : > { %v753_v11 = vadd.f32 %v752_v3, %v751_v28  ;;  %v759_v12 = vrot.slane %v758_v4, 2  ;;  %v766_v13 = vrot.slane %v765_v5, 2  ;;  %v772_v14 = vadd.f32 %v771_v6, %v770_v61 }
  0x73   : > { %v780_v15 = vrot.slane %v779_v36, 2  ;;  %v786_v0 = vadd.f32 %v785_v7, %v784_v63  ;;  %v793_v1 = vadd.f32 %v792_v8, %v791_v2  ;;  %v799_v16 = vrot.slane %v798_v10, 4 }
  0x74   : > { %v754_v18 = vrot.slane %v753_v11, 1  ;;  %v760_v19 = vadd.f32 %v759_v12, %v758_v4  ;;  %v767_v20 = vadd.f32 %v766_v13, %v765_v5  ;;  %v773_v21 = vrot.slane %v772_v14, 2 }
  0x75   : > { %v781_v22 = vadd.f32 %v780_v15, %v779_v36  ;;  %v787_v23 = vrot.slane %v786_v0, 2  ;;  %v794_v24 = vrot.slane %v793_v1, 2  ;;  %v800_v25 = vadd.f32 %v799_v16, %v798_v10 }
  0x76   : > { %v755_v27 = vadd.f32 %v754_v18, %v753_v11  ;;  %v761_v29 = vrot.slane %v760_v19, 1  ;;  %v768_v30 = vrot.slane %v767_v20, 1  ;;  %v774_v33 = vadd.f32 %v773_v21, %v772_v14 }
  0x77   : > { %v782_v34 = vrot.slane %v781_v22, 1  ;;  %v788_v37 = vadd.f32 %v787_v23, %v786_v0  ;;  %v795_v38 = vadd.f32 %v794_v24, %v793_v1  ;;  %v801_v39 = vrot.slane %v800_v25, 2 }
  0x78   : > { %v762_v42 = vadd.f32 %v761_v29, %v760_v19  ;;  %v769_v43 = vadd.f32 %v768_v30, %v767_v20  ;;  %v775_v44 = vrot.slane %v774_v33, 1  ;;  %v275_v17 = vsel %vm235_vm1, %v228_v26, 0.0 }
  0x79   : > { %v783_v45 = vadd.f32 %v782_v34, %v781_v22  ;;  %v789_v46 = vrot.slane %v788_v37, 1  ;;  %v796_v47 = vrot.slane %v795_v38, 1  ;;  %v802_v48 = vadd.f32 %v801_v39, %v800_v25 }
  0x7a   : > { %v776_v49 = vadd.f32 %v775_v44, %v774_v33  ;;  %v1178_v50 = vsel %vm1157_vm3, %v762_v42, %v755_v27  ;;  %v276_v31 = vsel %vm235_vm1, %v230_v41, 0.0  ;;  %v504_v40 = vcombine.high %v1883_v51, %v1883_v51 }
  0x7b   : > { %v790_v54 = vadd.f32 %v789_v46, %v788_v37  ;;  %v797_v55 = vadd.f32 %v796_v47, %v795_v38  ;;  %v803_v56 = vrot.slane %v802_v48, 1  ;;  %v1179_v57 = vsel %vm1159_vm4, %v769_v43, %v1178_v50 }
  0x7c   : > { %v1180_v58 = vsel %vm1161_vm5, %v776_v49, %v1179_v57  ;;  %v277_v59 = vadd.f32 %v276_v31, %v275_v17  ;;  %v511_v60 = vrot.slane %v1883_v51, %v1730_v9  ;;  %v518_v28 = vrot.slane %v504_v40, %v1730_v9 }
  0x7d   : > { %v804_v35 = vadd.f32 %v803_v56, %v802_v48  ;;  %v1181_v32 = vsel %vm1163_vm6, %v783_v45, %v1180_v58  ;;  %v1911_v61 = vsel %vm235_vm1, %v215_v52, 0.0  ;;  %v1914_v62 = vsel %vm235_vm1, %v217_v53, 0.0 }
  0x7e   : > { %v1182_v63 = vsel %vm1165_vm7, %v790_v54, %v1181_v32  ;;  %v519_v2 = vcombine.high %v511_v60, %v511_v60  ;;  %v520_v3 = vcombine.high %v518_v28, %v518_v28  ;;  %v521_v4 = vcombine.high %v277_v59, %v277_v59 }
  0x7f   : > { %v1183_v5 = vsel %vm1167_vm8, %v797_v55, %v1182_v63  ;;  %v528_v51 = vrot.slane %v277_v59, %v1730_v9  ;;  %v973_v6 = vsel %vm636_vm2, %v511_v60, 0.0  ;;  %v987_v36 = vsel %vm636_vm2, %v518_v28, 0.0  ;;  %v216_v55 = vld [vmem:[%s1725_s5 + $0x68] sm:$0xff]  ;;  %v218_v60 = vld [vmem:[%s1725_s5 + $0x78] sm:$0xff] }
  0x80   : > { %v1184_v7 = vsel %vm1169_vm9, %v804_v35, %v1183_v5  ;;  %v535_v8 = vrot.slane %v521_v4, %v1730_v9  ;;  %v974_v10 = vrot.slane %v973_v6, 4  ;;  %v980_v11 = vsel %vm636_vm2, %v519_v2, 0.0 }
  0x81   : > { %1491 = vmatprep.mubr.msk.f32.mxu0 %vm235_vm1, %v1184_v7  ;;  %v536_v12 = vcombine.high %v528_v51, %v528_v51  ;;  %v981_v13 = vrot.slane %v980_v11, 4  ;;  %v988_v14 = vrot.slane %v987_v36, 4  ;;  %v994_v15 = vsel %vm636_vm2, %v520_v3, 0.0 }
  0x82   : > { %v537_v0 = vcombine.high %v535_v8, %v535_v8  ;;  %v975_v1 = vadd.f32 %v974_v10, %v973_v6  ;;  %v995_v16 = vrot.slane %v994_v15, 4  ;;  %v1001_v18 = vsel %vm636_vm2, %v528_v51, 0.0  ;;  %v231_v51 = vld [vmem:[%s1725_s5 + $0xe0] sm:$0xff] }
  0x83   : > { %v982_v19 = vadd.f32 %v981_v13, %v980_v11  ;;  %v989_v20 = vadd.f32 %v988_v14, %v987_v36  ;;  %v1002_v21 = vrot.slane %v1001_v18, 4  ;;  %v1008_v22 = vsel %vm636_vm2, %v536_v12, 0.0 }
  0x84   : > { %v976_v23 = vrot.slane %v975_v1, 2  ;;  %v996_v24 = vadd.f32 %v995_v16, %v994_v15  ;;  %v1009_v25 = vrot.slane %v1008_v22, 4  ;;  %v1015_v26 = vsel %vm636_vm2, %v535_v8, 0.0 }
  0x85   : > { %v983_v27 = vrot.slane %v982_v19, 2  ;;  %v990_v29 = vrot.slane %v989_v20, 2  ;;  %v1003_v30 = vadd.f32 %v1002_v21, %v1001_v18  ;;  %v1016_v33 = vrot.slane %v1015_v26, 4 }
  0x86   : > { %v977_v34 = vadd.f32 %v976_v23, %v975_v1  ;;  %v997_v37 = vrot.slane %v996_v24, 2  ;;  %v1010_v38 = vadd.f32 %v1009_v25, %v1008_v22  ;;  %v1022_v39 = vsel %vm636_vm2, %v537_v0, 0.0 }
  0x87   : > { %v984_v41 = vadd.f32 %v983_v27, %v982_v19  ;;  %v991_v42 = vadd.f32 %v990_v29, %v989_v20  ;;  %v1004_v43 = vrot.slane %v1003_v30, 2  ;;  %v1017_v44 = vadd.f32 %v1016_v33, %v1015_v26 }
  0x88   : > { %v978_v17 = vrot.slane %v977_v34, 1  ;;  %v998_v45 = vadd.f32 %v997_v37, %v996_v24  ;;  %v1011_v46 = vrot.slane %v1010_v38, 2  ;;  %v1023_v47 = vrot.slane %v1022_v39, 4 }
  0x89   : > { %v985_v48 = vrot.slane %v984_v41, 1  ;;  %v992_v49 = vrot.slane %v991_v42, 1  ;;  %v1005_v50 = vadd.f32 %v1004_v43, %v1003_v30  ;;  %v1018_v31 = vrot.slane %v1017_v44, 2 }
  0x8a   : > { %v979_v40 = vadd.f32 %v978_v17, %v977_v34  ;;  %v999_v52 = vrot.slane %v998_v45, 1  ;;  %v1012_v53 = vadd.f32 %v1011_v46, %v1010_v38  ;;  %v1024_v54 = vadd.f32 %v1023_v47, %v1022_v39 }
  0x8b   : > { %v986_v56 = vadd.f32 %v985_v48, %v984_v41  ;;  %v993_v57 = vadd.f32 %v992_v49, %v991_v42  ;;  %v1006_v58 = vrot.slane %v1005_v50, 1  ;;  %v1019_v59 = vadd.f32 %v1018_v31, %v1017_v44 }
  0x8c   : > { %v1000_v28 = vadd.f32 %v999_v52, %v998_v45  ;;  %v1013_v35 = vrot.slane %v1012_v53, 1  ;;  %v1025_v32 = vrot.slane %v1024_v54, 2  ;;  %v256_v63 = vadd.f32 %v1914_v62, %v1911_v61 }
  0x8d   : > { %v1007_v2 = vadd.f32 %v1006_v58, %v1005_v50  ;;  %v1020_v3 = vrot.slane %v1019_v59, 1  ;;  %v1206_v4 = vsel %vm1157_vm3, %v986_v56, %v979_v40  ;;  %v257_v5 = vsel %vm235_vm1, %v216_v55, 0.0 }
  0x8e   : > { %v1014_v6 = vadd.f32 %v1013_v35, %v1012_v53  ;;  %v1026_v36 = vadd.f32 %v1025_v32, %v1024_v54  ;;  %v1207_v7 = vsel %vm1159_vm4, %v993_v57, %v1206_v4  ;;  %v258_v8 = vsel %vm235_vm1, %v218_v60, 0.0  ;;  %v233_v4 = vld [vmem:[%s1725_s5 + $0xf0] sm:$0xff] }
  0x8f   : > { %v1021_v10 = vadd.f32 %v1020_v3, %v1019_v59  ;;  %v1208_v11 = vsel %vm1161_vm5, %v1000_v28, %v1207_v7  ;;  %v259_v12 = vadd.f32 %v258_v8, %v257_v5  ;;  %v402_v13 = vcombine.high %v256_v63, %v256_v63 }
  0x90   : > { %v1027_v14 = vrot.slane %v1026_v36, 1  ;;  %v1209_v61 = vsel %vm1163_vm6, %v1007_v2, %v1208_v11  ;;  %v409_v62 = vrot.slane %v256_v63, %v1730_v9  ;;  %v1943_v15 = vsel %vm235_vm1, %v231_v51, 0.0 }
  0x91   : > { %v1210_v0 = vsel %vm1165_vm7, %v1014_v6, %v1209_v61  ;;  %v416_v1 = vrot.slane %v402_v13, %v1730_v9  ;;  %v419_v16 = vcombine.high %v259_v12, %v259_v12  ;;  %v426_v18 = vrot.slane %v259_v12, %v1730_v9  ;;  %v232_v12 = vld [vmem:[%s1725_s5 + $0xe8] sm:$0xff] }
  0x92   : > { %v1028_v19 = vadd.f32 %v1027_v14, %v1026_v36  ;;  %v1211_v20 = vsel %vm1167_vm8, %v1021_v10, %v1210_v0  ;;  %v417_v21 = vcombine.high %v409_v62, %v409_v62  ;;  %v805_v22 = vsel %vm636_vm2, %v409_v62, 0.0 }
  0x93   : > { %v418_v23 = vcombine.high %v416_v1, %v416_v1  ;;  %v433_v24 = vrot.slane %v419_v16, %v1730_v9  ;;  %v434_v25 = vcombine.high %v426_v18, %v426_v18  ;;  %v806_v26 = vrot.slane %v805_v22, 4 }
  0x94   : > { %v1212_v27 = vsel %vm1169_vm9, %v1028_v19, %v1211_v20  ;;  %v812_v29 = vsel %vm636_vm2, %v417_v21, 0.0  ;;  %v819_v30 = vsel %vm636_vm2, %v416_v1, 0.0  ;;  %v833_v33 = vsel %vm636_vm2, %v426_v18, 0.0  ;;  %v234_v19 = vld [vmem:[%s1725_s5 + $0xf8] sm:$0xff] }
  0x95   : > { %1497 = vmatprep.mubr.msk.f32.mxu1 %vm235_vm1, %v1212_v27  ;;  %v435_v34 = vcombine.high %v433_v24, %v433_v24  ;;  %v807_v37 = vadd.f32 %v806_v26, %v805_v22  ;;  %v813_v38 = vrot.slane %v812_v29, 4  ;;  %v820_v39 = vrot.slane %v819_v30, 4 }
  0x96   : > { %v826_v41 = vsel %vm636_vm2, %v418_v23, 0.0  ;;  %v834_v42 = vrot.slane %v833_v33, 4  ;;  %v840_v43 = vsel %vm636_vm2, %v434_v25, 0.0  ;;  %v847_v44 = vsel %vm636_vm2, %v433_v24, 0.0 }
  0x97   : > { %v808_v17 = vrot.slane %v807_v37, 2  ;;  %v814_v45 = vadd.f32 %v813_v38, %v812_v29  ;;  %v821_v46 = vadd.f32 %v820_v39, %v819_v30  ;;  %v827_v47 = vrot.slane %v826_v41, 4 }
  0x98   : > { %v835_v48 = vadd.f32 %v834_v42, %v833_v33  ;;  %v841_v49 = vrot.slane %v840_v43, 4  ;;  %v848_v50 = vrot.slane %v847_v44, 4  ;;  %v854_v31 = vsel %vm636_vm2, %v435_v34, 0.0 }
  0x99   : > { %v809_v40 = vadd.f32 %v808_v17, %v807_v37  ;;  %v815_v52 = vrot.slane %v814_v45, 2  ;;  %v822_v53 = vrot.slane %v821_v46, 2  ;;  %v828_v54 = vadd.f32 %v827_v47, %v826_v41 }
  0x9a   : > { %v836_v55 = vrot.slane %v835_v48, 2  ;;  %v842_v56 = vadd.f32 %v841_v49, %v840_v43  ;;  %v849_v57 = vadd.f32 %v848_v50, %v847_v44  ;;  %v855_v58 = vrot.slane %v854_v31, 4 }
  0x9b   : > { %v810_v59 = vrot.slane %v809_v40, 1  ;;  %v816_v60 = vadd.f32 %v815_v52, %v814_v45  ;;  %v823_v28 = vadd.f32 %v822_v53, %v821_v46  ;;  %v829_v35 = vrot.slane %v828_v54, 2 }
  0x9c   : > { %v837_v32 = vadd.f32 %v836_v55, %v835_v48  ;;  %v843_v63 = vrot.slane %v842_v56, 2  ;;  %v850_v2 = vrot.slane %v849_v57, 2  ;;  %v856_v3 = vadd.f32 %v855_v58, %v854_v31 }
  0x9d   : > { %v811_v5 = vadd.f32 %v810_v59, %v809_v40  ;;  %v817_v51 = vrot.slane %v816_v60, 1  ;;  %v824_v6 = vrot.slane %v823_v28, 1  ;;  %v830_v36 = vadd.f32 %v829_v35, %v828_v54 }
  0x9e   : > { %v838_v7 = vrot.slane %v837_v32, 1  ;;  %v844_v8 = vadd.f32 %v843_v63, %v842_v56  ;;  %v851_v10 = vadd.f32 %v850_v2, %v849_v57  ;;  %v857_v11 = vrot.slane %v856_v3, 2 }
  0x9f   : > { %v818_v13 = vadd.f32 %v817_v51, %v816_v60  ;;  %v825_v14 = vadd.f32 %v824_v6, %v823_v28  ;;  %v831_v61 = vrot.slane %v830_v36, 1  ;;  %v279_v62 = vsel %vm235_vm1, %v233_v4, 0.0 }
  0xa0   : > { %v839_v0 = vadd.f32 %v838_v7, %v837_v32  ;;  %v845_v1 = vrot.slane %v844_v8, 1  ;;  %v852_v16 = vrot.slane %v851_v10, 1  ;;  %v858_v18 = vadd.f32 %v857_v11, %v856_v3 }
  0xa1   : > { %v832_v20 = vadd.f32 %v831_v61, %v830_v36  ;;  %v1185_v21 = vsel %vm1157_vm3, %v818_v13, %v811_v5  ;;  %v280_v22 = vadd.f32 %v279_v62, %v1943_v15  ;;  %v281_v23 = vsel %vm235_vm1, %v232_v12, 0.0 }
  0xa2   : > { %v846_v24 = vadd.f32 %v845_v1, %v844_v8  ;;  %v853_v25 = vadd.f32 %v852_v16, %v851_v10  ;;  %v859_v26 = vrot.slane %v858_v18, 1  ;;  %v1186_v27 = vsel %vm1159_vm4, %v825_v14, %v1185_v21 }
  0xa3   : > { %v1187_v29 = vsel %vm1161_vm5, %v832_v20, %v1186_v27  ;;  %v282_v30 = vsel %vm235_vm1, %v234_v19, 0.0  ;;  %v538_v33 = vcombine.high %v280_v22, %v280_v22  ;;  %v545_v34 = vrot.slane %v280_v22, %v1730_v9 }
  0xa4   : > { %v860_v37 = vadd.f32 %v859_v26, %v858_v18  ;;  %v1188_v38 = vsel %vm1163_vm6, %v839_v0, %v1187_v29  ;;  %v283_v39 = vadd.f32 %v282_v30, %v281_v23 }
  0xa5   : > { %v1189_v15 = vsel %vm1165_vm7, %v846_v24, %v1188_v38  ;;  %v552_v41 = vrot.slane %v538_v33, %v1730_v9  ;;  %v553_v42 = vcombine.high %v545_v34, %v545_v34  ;;  %v1029_v43 = vsel %vm636_vm2, %v545_v34, 0.0 }
  0xa6   : > { %v1190_v44 = vsel %vm1167_vm8, %v853_v25, %v1189_v15  ;;  %v555_v17 = vcombine.high %v283_v39, %v283_v39  ;;  %v562_v45 = vrot.slane %v283_v39, %v1730_v9  ;;  %v1030_v46 = vrot.slane %v1029_v43, 4 }
  0xa7   : > { %v1191_v47 = vsel %vm1169_vm9, %v860_v37, %v1190_v44  ;;  %v554_v48 = vcombine.high %v552_v41, %v552_v41  ;;  %v1036_v49 = vsel %vm636_vm2, %v553_v42, 0.0  ;;  %v1043_v50 = vsel %vm636_vm2, %v552_v41, 0.0 }
  0xa8   : > { %1492 = vmatmul.mubr.msk.f32.gmra.mxu0 %vm235_vm1, %v1191_v47  ;;  %v569_v31 = vrot.slane %v555_v17, %v1730_v9  ;;  %v570_v40 = vcombine.high %v562_v45, %v562_v45  ;;  %v1031_v52 = vadd.f32 %v1030_v46, %v1029_v43  ;;  %v1037_v53 = vrot.slane %v1036_v49, 4 }
  0xa9   : > { %v1044_v54 = vrot.slane %v1043_v50, 4  ;;  %v1050_v55 = vsel %vm636_vm2, %v554_v48, 0.0  ;;  %v1057_v56 = vsel %vm636_vm2, %v562_v45, 0.0 }
  0xaa   : > { %v571_v57 = vcombine.high %v569_v31, %v569_v31  ;;  %v1032_v58 = vrot.slane %v1031_v52, 2  ;;  %v1038_v59 = vadd.f32 %v1037_v53, %v1036_v49  ;;  %v1051_v60 = vrot.slane %v1050_v55, 4  ;;  %v1460_v49 = vld [vmem:[%s2066_s2] ss:$0 sm:$0xff] }
  0xab   : > { %v1045_v28 = vadd.f32 %v1044_v54, %v1043_v50  ;;  %v1058_v35 = vrot.slane %v1057_v56, 4  ;;  %v1064_v32 = vsel %vm636_vm2, %v570_v40, 0.0  ;;  %v1071_v63 = vsel %vm636_vm2, %v569_v31, 0.0 }
  0xac   : > { %v1033_v2 = vadd.f32 %v1032_v58, %v1031_v52  ;;  %v1039_v9 = vrot.slane %v1038_v59, 2  ;;  %v1052_v3 = vadd.f32 %v1051_v60, %v1050_v55  ;;  %v1065_v4 = vrot.slane %v1064_v32, 4 }
  0xad   : > { %v1046_v5 = vrot.slane %v1045_v28, 2  ;;  %v1059_v51 = vadd.f32 %v1058_v35, %v1057_v56  ;;  %v1072_v6 = vrot.slane %v1071_v63, 4  ;;  %v1078_v36 = vsel %vm636_vm2, %v571_v57, 0.0 }
  0xae   : > { %v1034_v7 = vrot.slane %v1033_v2, 1  ;;  %v1040_v8 = vadd.f32 %v1039_v9, %v1038_v59  ;;  %v1053_v10 = vrot.slane %v1052_v3, 2  ;;  %v1066_v11 = vadd.f32 %v1065_v4, %v1064_v32 }
  0xaf   : > { %v1047_v12 = vadd.f32 %v1046_v5, %v1045_v28  ;;  %v1060_v13 = vrot.slane %v1059_v51, 2  ;;  %v1073_v14 = vadd.f32 %v1072_v6, %v1071_v63  ;;  %v1079_v61 = vrot.slane %v1078_v36, 4 }
  0xb0   : > { %v1035_v62 = vadd.f32 %v1034_v7, %v1033_v2  ;;  %v1041_v0 = vrot.slane %v1040_v8, 1  ;;  %v1054_v1 = vadd.f32 %v1053_v10, %v1052_v3  ;;  %v1067_v16 = vrot.slane %v1066_v11, 2 }
  0xb1   : > { %v1048_v18 = vrot.slane %v1047_v12, 1  ;;  %v1061_v19 = vadd.f32 %v1060_v13, %v1059_v51  ;;  %v1074_v20 = vrot.slane %v1073_v14, 2  ;;  %v1080_v21 = vadd.f32 %v1079_v61, %v1078_v36 }
  0xb2   : > { %v1042_v22 = vadd.f32 %v1041_v0, %v1040_v8  ;;  %v1055_v23 = vrot.slane %v1054_v1, 1  ;;  %v1068_v24 = vadd.f32 %v1067_v16, %v1066_v11 }
  0xb3   : > { %v1049_v25 = vadd.f32 %v1048_v18, %v1047_v12  ;;  %v1062_v26 = vrot.slane %v1061_v19, 1  ;;  %v1075_v27 = vadd.f32 %v1074_v20, %v1073_v14  ;;  %v1081_v29 = vrot.slane %v1080_v21, 2 }
  0xb4   : > { %v1056_v30 = vadd.f32 %v1055_v23, %v1054_v1  ;;  %v1069_v33 = vrot.slane %v1068_v24, 1  ;;  %v1213_v34 = vsel %vm1157_vm3, %v1042_v22, %v1035_v62 }
  0xb5   : > { %v1063_v37 = vadd.f32 %v1062_v26, %v1061_v19  ;;  %v1076_v38 = vrot.slane %v1075_v27, 1  ;;  %v1082_v39 = vadd.f32 %v1081_v29, %v1080_v21  ;;  %v1214_v15 = vsel %vm1159_vm4, %v1049_v25, %v1213_v34 }
  0xb6   : > { %v1070_v41 = vadd.f32 %v1069_v33, %v1068_v24  ;;  %v1215_v42 = vsel %vm1161_vm5, %v1056_v30, %v1214_v15 }
  0xb7   : > { %v1077_v43 = vadd.f32 %v1076_v38, %v1075_v27  ;;  %v1083_v44 = vrot.slane %v1082_v39, 1  ;;  %v1216_v17 = vsel %vm1163_vm6, %v1063_v37, %v1215_v42 }
  0xb8   : > { %v1217_v45 = vsel %vm1165_vm7, %v1070_v41, %v1216_v17 }
  0xb9   : > { %v1084_v46 = vadd.f32 %v1083_v44, %v1082_v39  ;;  %v1218_v47 = vsel %vm1167_vm8, %v1077_v43, %v1217_v45 }
  0xbb   : > { %v1219_v48 = vsel %vm1169_vm9, %v1084_v46, %v1218_v47 }
  0xbc   : > { %1498 = vmatmul.mubr.msk.f32.gmra.mxu1 %vm235_vm1, %v1219_v48 }
 0x119   : > { %v1490_v50 = vpop.f32.mrf.mxu0 }
 0x11a   : > { %v1312_v31 = vadd.f32 %v1490_v50, %v1460_v49 }
 0x11b   : > { %v1306_v40 = vpop.f32.mrf.mxu0 }
 0x11c   : > { %1347 = vst.msk [vmem:[%s190_s10 + $0x8] sm:$0xff] %vm1345_vm10, %v1312_v31  ;;  %v1307_v52 = vadd.f32 %v1460_v49, %v1306_v40 }
 0x11e   : > { %1346 = vst.msk [vmem:[%s190_s10] sm:$0xff] %vm1345_vm10, %v1307_v52 }
 0x12d   : > { %v1496_v53 = vpop.f32.mrf.mxu1 }
 0x12e   : > { %v1332_v54 = vadd.f32 %v1496_v53, %v1460_v49 }
 0x12f   : > { %v1326_v55 = vpop.f32.mrf.mxu1 }
 0x130   : > { %1351 = vst.msk [vmem:[%s190_s10 + $0x28] sm:$0xff] %vm1345_vm10, %v1332_v54  ;;  %v1327_v56 = vadd.f32 %v1460_v49, %v1326_v55 }
 0x132   : > { %1350 = vst.msk [vmem:[%s190_s10 + $0x20] sm:$0xff] %vm1345_vm10, %v1327_v56 }
 0x168   : > { %v1493_v57 = vpop.f32.mrf.mxu0 }
 0x169   : > { %v1322_v58 = vadd.f32 %v1493_v57, %v1460_v49 }
 0x16a   : > { %v1316_v59 = vpop.f32.mrf.mxu0 }
 0x16b   : > { %1349 = vst.msk [vmem:[%s190_s10 + $0x18] sm:$0xff] %vm1345_vm10, %v1322_v58  ;;  %v1317_v60 = vadd.f32 %v1460_v49, %v1316_v59 }
 0x16d   : > { %1348 = vst.msk [vmem:[%s190_s10 + $0x10] sm:$0xff] %vm1345_vm10, %v1317_v60 }
 0x17c   : > { %v1499_v28 = vpop.f32.mrf.mxu1 }
 0x17d   : > { %v1342_v35 = vadd.f32 %v1499_v28, %v1460_v49 }
 0x17e   : > { %v1336_v32 = vpop.f32.mrf.mxu1 }
 0x17f   : > { %1353 = vst.msk [vmem:[%s190_s10 + $0x38] sm:$0xff] %vm1345_vm10, %v1342_v35  ;;  %v1337_v63 = vadd.f32 %v1460_v49, %v1336_v32 }
 0x181   : > { %1352 = vst.msk [vmem:[%s190_s10 + $0x30] sm:$0xff] %vm1345_vm10, %v1337_v63 }
 0x182   : > { %1573 = shalt.err (!%p1570_p5)
}
 0x183   : > { %s1574_s30 = scalar_lea.hbm %s2011_s23, 1024  ;;  %s1578_s6 = scalar_lea.hbm %s2067_s3, 2048 }
 0x184   : > { %p1575_p6 = scmp.ne.s32.totalorder %s2011_s23, %s1574_s30  ;;  %p1579_p10 = scmp.lt.s32.totalorder %s2011_s23, %s2067_s3 }
 0x185   : > { %p1580_p11 = scmp.lt.s32.totalorder %s1578_s6, %s1574_s30 }
 0x186   : > { %p1576_p7 = pnand %p1575_p6, %p1702_p4 }
 0x187   : > { %p1581_p12 = por %p1580_p11, %p1579_p10 }
 0x188   : > { %p1577_p9 = pneg %p1576_p7 }
 0x18a   : > { %p1582_p13 = pnand %p1581_p12, %p1577_p9 }
 0x18c   : > { %1585 = shalt.err (!%p1582_p13)
}
 0x18d   : > { %s1640_s9 = smov 128   ;;  %s1641_s10 = smov 8  }
 0x18e   : > { %1502 = dma.vmem_to_hbm [thread:$0]  (%p1702_p4), %s2013_s18, 1024, %s2011_s23, %s2019_s15, %s1640_s9, %s1640_s9, %s1641_s10  }
 0x18f PF: > { %p1508_p0 = scmp.ge.s32.totalorder %s1636_s17, 2  ;;  %s1385_s11 = sand.u32 1, %s1616_s12  }
 0x190   : > { %s1386_s19 = scalar_lea.sflag [#allocation3], %s1385_s11 }
 0x191   : > { %p1505_p1 = pnand %p1508_p0, %p1709_p8 }
 0x193   : > { %p1506_p2 = pneg %p1505_p1 }
 0x195   : > { %1611 = dma.done.wait (%p1506_p2), %s1386_s19, 1024  }
 0x196   : > { %1613 = vsyncadd (%p1506_p2), %s1386_s19, 4294966272  ;;  %s16_s17 = sadd.s32 1, %s1636_s17   ;;  %s2070_s12 = smov %s1620_s13 }
 0x197   : > { %p13_p3 = scmp.ge.s32.totalorder %s16_s17, 4   ;;  %s2071_s13 = smov %s1624_s14 }
 0x198   : > { %s2072_s14 = smov %s1715_s25  ;;  %s2073_s15 = smov %s1632_s16 }
 0x199   : > { %s2074_s16 = smov %s2076_s20  ;;  %15 = sbr.rel (!%p13_p3) target bundleno = 4 (0x4), region = 67 }
 0x19e   :  { %1391 = vsyncpa [#allocation3], 1 }
 0x19f   :  { %1393 = vsyncpa [#allocation3 + $0x1], 1 }

</bundles_post_ra>
